<compile_context>
chip_gen: v7x
topology: tpu7x:2x2x1
jax: 0.10.0
libtpu: 0.0.40
codegen_flags: <defaults>
</compile_context>

<pallas_src>
import jax
import jax.numpy as jnp
from jax.experimental import pallas as pl
from jax.experimental.pallas import tpu as pltpu


_TARGET_TILE_BYTES = 4 * 1024 * 1024   # per operand per pipeline buffer
_MAX_LANES = 1024                      # lane-dense last dim cap (multiple of 128)
_VMEM_LIMIT_BYTES = 32 * 1024 * 1024   # safe on v5e / v6e / v7x


def _add_pos_embed_kernel(x_ref, pos_ref, o_ref):
    # x_ref / pos_ref / o_ref are (row_tile, lanes) VMEM tiles.
    # Add in the promoted dtype; single cast on the way out (VPU slot is free
    # here — this kernel is HBM-bound).
    o_ref[...] = (x_ref[...] + pos_ref[...]).astype(o_ref.dtype)


def _choose_lanes(m):
    """Largest multiple-of-128 divisor of m (capped), else m (full-dim block)."""
    if m % 128 != 0:
        return m
    lanes = 128
    while lanes * 2 <= _MAX_LANES and m % (lanes * 2) == 0:
        lanes *= 2
    return lanes


def learnable_position_embedding(x, pos_embed, *, donate_x=False):
    """Returns x + pos_embed.

    x: (B, F, E).  pos_embed: (B, F, E) (per-batch parameter, as in the
    reference module) or (1, F, E) / (F, E) (shared across batch; the
    broadcast is expressed in the BlockSpec, never materialized in HBM).
    Output dtype follows jnp type promotion of (x, pos_embed).
    """
    B, F, E = x.shape
    if pos_embed.shape == x.shape:
        shared = False
    elif pos_embed.shape in ((F, E), (1, F, E)):
        shared = True
    else:
        raise ValueError(
            f"pos_embed shape {pos_embed.shape} incompatible with x {x.shape}")

    out_dtype = jnp.result_type(x.dtype, pos_embed.dtype)

    # ----- lane-dense per-batch slab: (B, rows, lanes), rows*lanes == F*E ----
    m = F * E
    lanes = _choose_lanes(m)
    rows = m // lanes

    itemsize = max(jnp.dtype(x.dtype).itemsize,
                   jnp.dtype(pos_embed.dtype).itemsize,
                   jnp.dtype(out_dtype).itemsize)
    rows_target = max(1, _TARGET_TILE_BYTES // (lanes * itemsize))
    if rows <= rows_target:
        row_tile = rows                                # block == full dim (legal)
    else:
        row_tile = max(32, (rows_target // 32) * 32)   # mult of 8/16/32 packings

    # Batch is the innermost grid axis so a shared pos tile stays resident.
    grid = (pl.cdiv(rows, row_tile), B)

    x3 = x.reshape(B, rows, lanes)                     # free bitcast
    x_spec = pl.BlockSpec((None, row_tile, lanes), lambda i, b: (b, i, 0))
    out_spec = pl.BlockSpec((None, row_tile, lanes), lambda i, b: (b, i, 0))

    if shared:
        pos_in = pos_embed.reshape(rows, lanes)        # free bitcast
        # index_map ignores the innermost (batch) grid axis -> the pos tile is
        # DMA'd once per row-tile and reused across the whole batch loop.
        pos_spec = pl.BlockSpec((row_tile, lanes), lambda i, b: (i, 0))
    else:
        pos_in = pos_embed.reshape(B, rows, lanes)     # free bitcast
        pos_spec = pl.BlockSpec((None, row_tile, lanes), lambda i, b: (b, i, 0))

    aliases = {0: 0} if (donate_x and x.dtype == out_dtype) else {}

    out3 = pl.pallas_call(
        _add_pos_embed_kernel,
        out_shape=jax.ShapeDtypeStruct((B, rows, lanes), out_dtype),
        grid_spec=pltpu.PrefetchScalarGridSpec(
            num_scalar_prefetch=0,
            grid=grid,
            in_specs=[x_spec, pos_spec],
            out_specs=out_spec,
        ),
        compiler_params=pltpu.CompilerParams(
            dimension_semantics=("parallel", "parallel"),
            # ~4 MiB/operand tiles x 3 operands x 2 pipeline buffers ~ 24 MiB.
            # Explicit override needed on v5e (16 MiB scoped default); stays
            # within v7x's 64 MiB-per-TC VMEM.
            vmem_limit_bytes=_VMEM_LIMIT_BYTES,
        ),
        input_output_aliases=aliases,
    )(x3, pos_in)

    return out3.reshape(B, F, E)                       # free bitcast


if __name__ == "__main__":
    # Shapes implied by the module: (batch_size, fea_num, d_model)
    batch_size, fea_num, d_model = 2, 8, 32
    key = jax.random.PRNGKey(0)
    kx, kp = jax.random.split(key)
    x = jax.random.normal(kx, (batch_size, fea_num, d_model), dtype=jnp.float32)

    # Module's actual init (zeros) -> identity.
    # TODO(synk): parameter creation / zero-init lives outside the kernel.
    zeros_pe = jnp.zeros((batch_size, fea_num, d_model), jnp.float32)
    out0 = jax.block_until_ready(learnable_position_embedding(x, zeros_pe))
    assert out0.shape == x.shape and out0.dtype == x.dtype
    assert jnp.allclose(out0, x)

    # Non-zero per-batch (B,F,E) parameter so the add is actually exercised.
    pe = jax.random.normal(kp, (batch_size, fea_num, d_model), dtype=jnp.float32)
    out = jax.block_until_ready(learnable_position_embedding(x, pe))
    assert jnp.allclose(out, x + pe, atol=1e-6)

    # Batch-shared (1,F,E) pos: broadcast via BlockSpec; larger shape exercises
    # the multi-row-tile grid and the resident pos tile.
    xb = jax.random.normal(kx, (2, 4096, 512), dtype=jnp.float32)
    pb = jax.random.normal(kp, (1, 4096, 512), dtype=jnp.float32)
    outb = jax.block_until_ready(learnable_position_embedding(xb, pb))
    assert jnp.allclose(outb, xb + pb, atol=1e-6)

    # Mixed dtype: add in promoted dtype (f32), matching torch promotion.
    xm = xb.astype(jnp.bfloat16)
    outm = jax.block_until_ready(learnable_position_embedding(xm, pb))
    assert outm.dtype == jnp.float32
    assert jnp.allclose(outm, xm.astype(jnp.float32) + pb, atol=1e-5)

    # F*E not a multiple of 128 -> full-dim fallback block, (F,E)-shaped pos.
    xo = jax.random.normal(kx, (3, 5, 48), dtype=jnp.float32)
    po = jax.random.normal(kp, (5, 48), dtype=jnp.float32)
    outo = jax.block_until_ready(learnable_position_embedding(xo, po))
    assert jnp.allclose(outo, xo + po[None], atol=1e-6)

    print("KERNEL_OK")
</pallas_src>

<mosaic_0001>
module attributes {stable_mosaic.version = 11 : i64} {
  func.func @_add_pos_embed_kernel(%arg0: i32, %arg1: i32, %arg2: memref<1x1x256xf32, #tpu.memory_space<vmem>>, %arg3: memref<1x1x256xf32, #tpu.memory_space<vmem>>, %arg4: memref<1x1x256xf32, #tpu.memory_space<vmem>>) attributes {dimension_semantics = [#tpu.dimension_semantics<parallel>, #tpu.dimension_semantics<parallel>], iteration_bounds = array<i64: 1, 2>, scalar_prefetch = 0 : i64, scratch_operands = 0 : i64, tpu.core_type = #tpu.core_type<tc>, window_params = [{transform_indices = @transform_0, window_bounds = array<i64: 1, 1, 256>}, {transform_indices = @transform_1, window_bounds = array<i64: 1, 1, 256>}, {transform_indices = @transform_2, window_bounds = array<i64: 1, 1, 256>}]} {
    %c0 = arith.constant 0 : index
    %c0_0 = arith.constant 0 : index
    %c0_1 = arith.constant 0 : index
    %0 = vector.load %arg2[%c0, %c0_0, %c0_1] : memref<1x1x256xf32, #tpu.memory_space<vmem>>, vector<1x1x256xf32>
    %1 = vector.shape_cast %0 : vector<1x1x256xf32> to vector<1x256xf32>
    %c0_2 = arith.constant 0 : index
    %c0_3 = arith.constant 0 : index
    %c0_4 = arith.constant 0 : index
    %2 = vector.load %arg3[%c0_2, %c0_3, %c0_4] : memref<1x1x256xf32, #tpu.memory_space<vmem>>, vector<1x1x256xf32>
    %3 = vector.shape_cast %2 : vector<1x1x256xf32> to vector<1x256xf32>
    %4 = arith.addf %1, %3 : vector<1x256xf32>
    %c0_5 = arith.constant 0 : index
    %c0_6 = arith.constant 0 : index
    %c0_7 = arith.constant 0 : index
    %5 = vector.load %arg4[%c0_5, %c0_6, %c0_7] : memref<1x1x256xf32, #tpu.memory_space<vmem>>, vector<1x1x256xf32>
    %6 = vector.shape_cast %5 : vector<1x1x256xf32> to vector<1x256xf32>
    %7 = vector.shape_cast %4 : vector<1x256xf32> to vector<1x1x256xf32>
    tpu.vector_store %arg4[%c0_5, %c0_6, %c0_7], %7 {strides = array<i32>} : memref<1x1x256xf32, #tpu.memory_space<vmem>>, vector<1x1x256xf32>,
    return
  }
  func.func @transform_0(%arg0: i32, %arg1: i32) -> (i32, i32, i32) {
    %c0_i32 = arith.constant 0 : i32
    %c0_i32_0 = arith.constant 0 : i32
    return %arg1, %arg0, %c0_i32 : i32, i32, i32
  }
  func.func @transform_1(%arg0: i32, %arg1: i32) -> (i32, i32, i32) {
    %c0_i32 = arith.constant 0 : i32
    %c0_i32_0 = arith.constant 0 : i32
    return %arg1, %arg0, %c0_i32 : i32, i32, i32
  }
  func.func @transform_2(%arg0: i32, %arg1: i32) -> (i32, i32, i32) {
    %c0_i32 = arith.constant 0 : i32
    %c0_i32_0 = arith.constant 0 : i32
    return %arg1, %arg0, %c0_i32 : i32, i32, i32
  }
}

</mosaic_0001>

<bundles_post_ra>
// kernel: tpu_custom_call.1
= control target key start
LH: loop header
LB: loop body
LE: loop exit
PB: predicated region body
PF: predicated region fallthrough
CT: control target
= control target key end

     0   :  { %7 = vsyncpa [#allocation3], 0  ;;  %s830_s0 = inlined_call_operand.hbm [shape: f32[2,1,256], index: 0, kind: input, shape index: {}]   ;;  %s831_s1 = inlined_call_operand.hbm [shape: f32[2,1,256], index: 1, kind: input, shape index: {}]   ;;  %s832_s2 = inlined_call_operand.hbm [shape: f32[2,1,256], index: 2, kind: output, shape index: {}]  }
   0x1   :  { %9 = vsyncpa [#allocation3 + $0x1], 0 }
   0x2   :  { %10 = vsyncpa [#allocation6], 0 }
   0x3   :  { %12 = vsyncpa [#allocation6 + $0x1], 0 }
   0x4   :  { %13 = vsyncpa [#allocation4], 0 }
   0x5   :  { %15 = vsyncpa [#allocation4 + $0x1], 0  ;;  %s610_s9 = smov 0   ;;  %s612_s10 = smov 0  }
   0x6   :  { %s614_s11 = smov 0   ;;  %s616_s12 = smov 0  }
   0x7   :  { %s618_s13 = smov 0   ;;  %s620_s14 = smov 0  }
   0x8 LB: > { %s355_s15 = sadd.s32 4294967295, %s590_s14   ;;  %s356_s16 = sadd.s32 4294967294, %s590_s14   ;;  %s590_s14 = sphi %s620_s14, %s21_s14   ;;  %s586_s13 = sphi %s618_s13, %s852_s13   ;;  %s582_s12 = sphi %s616_s12, %s851_s12   ;;  %s578_s11 = sphi %s614_s11, %s850_s11   ;;  %s574_s10 = sphi %s612_s10, %s849_s10   ;;  %s570_s9 = sphi %s610_s9, %s848_s9  }
   0x9   : > { %s30_s17 = sadd.s32 1, %s586_s13  ;;  %s42_s18 = sadd.s32 1, %s578_s11 }
   0xa   : > { %p31_p0 = scmp.ge.s32.totalorder %s30_s17, 2  ;;  %p49_p1 = scmp.ne.s32.totalorder %s578_s11, %s574_s10 }
   0xb   : > { %p50_p2 = scmp.eq.s32.totalorder %s590_s14, 0  ;;  %p55_p3 = scmp.ne.s32.totalorder %s574_s10, %s570_s9 }
   0xc   : > { %s854_s17 = smov (%p31_p0, %s30_s17), 0  ;;  %p56_p5 = scmp.eq.s32.totalorder %s355_s15, 0 }
   0xd   : > { %p651_p4 = por %p50_p2, %p49_p1  ;;  %s37_s20 = ssub.s32 %s586_s13, %s854_s17 }
   0xe   : > { %p109_p6 = scmp.eq.s32.totalorder %s355_s15, 1  ;;  %p40_p7 = scmp.eq.s32.totalorder %s37_s20, 0 }
   0xf   : > { %p657_p8 = por %p56_p5, %p55_p3  ;;  %p115_p10 = scmp.eq.s32.totalorder %s356_s16, 1 }
  0x10   : > { %p661_p9 = por %p109_p6, %p49_p1  ;;  %p394_p13 = scmp.lt.s32.totalorder %s590_s14, 2 }
  0x11   : > { %s836_s21 = scalar_select %p657_p8, 1, 0 }
  0x12   : > { %s837_s22 = scalar_select %p661_p9, 1, 0 }
  0x13   : > { %s666_s23 = scalar_select %p40_p7, %s578_s11, %s42_s18  }
  0x14   : > { %p668_p11 = por %p115_p10, %p55_p3  ;;  %s675_s25 = sand.u32 1, %s578_s11  }
  0x15   : > { %s359_s26 = sshll.u32 %s675_s25, 1  ;;  %s374_s27 = sshll.u32 %s586_s13, 5 }
  0x16   : > { %s838_s24 = scalar_select %p668_p11, 1, 0 }
  0x17   : > { %s684_s30 = scalar_lea.hbm %s830_s0, %s374_s27  ;;  %s139_s3 = scalar_lea.vmem [#allocation2], %s359_s26 }
  0x18   : > { %s149_s4 = sshll.u32 %s139_s3, 4  ;;  %p692_p0 = pnand %p394_p13, %p651_p4  ;;  %s688_s4 = int_to_ptr.vmem [resolvable:$true] %s149_s4 }
  0x19   : > { %s136_s6 = scalar_lea.sflag [#allocation3], %s675_s25  ;;  %s444_s7 = scalar_lea.hbm %s684_s30, 32 }
  0x1a   : > { %p445_p3 = scmp.ne.s32.totalorder %s684_s30, %s444_s7  ;;  %p446_p5 = pneg %p692_p0 }
  0x1b   : > { %s449_s16 = scalar_lea.hbm %s830_s0, 64  ;;  %p450_p4 = scmp.lt.u32.totalorder %s684_s30, %s830_s0 }
  0x1c   : > { %p447_p6 = pnand %p446_p5, %p445_p3  ;;  %p451_p10 = scmp.lt.u32.totalorder %s449_s16, %s444_s7 }
  0x1d   : > { %p453_p12 = scmp.lt.u32.totalorder %s444_s7, %s684_s30 }
  0x1e   : > { %p448_p7 = pneg %p447_p6  ;;  %p452_p13 = por %p451_p10, %p450_p4 }
  0x20   : > { %p454_p1 = por %p453_p12, %p452_p13 }
  0x22   : > { %p455_p2 = pnand %p454_p1, %p448_p7 }
  0x24   : > { %458 = shalt.err (!%p455_p2)
}
  0x25   : > { %s459_s20 = scalar_lea.vmem %s688_s4, 32  ;;  %s592_s28 = smov [#allocation2]  }
  0x26   : > { %p460_p3 = scmp.ne.s32.totalorder %s688_s4, %s459_s20  ;;  %s464_s29 = sshll.u32 %s592_s28, 4  ;;  %s465_s29 = int_to_ptr.vmem [resolvable:$false] %s464_s29 }
  0x27   : > { %s466_s3 = scalar_lea.vmem %s465_s29, 64  ;;  %p467_p9 = scmp.lt.s32.totalorder %s688_s4, %s465_s29 }
  0x28   : > { %p462_p6 = pnand %p460_p3, %p446_p5  ;;  %p468_p4 = scmp.lt.s32.totalorder %s466_s3, %s459_s20 }
  0x2a   : > { %p463_p11 = pneg %p462_p6  ;;  %p469_p10 = por %p468_p4, %p467_p9 }
  0x2c   : > { %p470_p12 = pnand %p469_p10, %p463_p11 }
  0x2e   : > { %473 = shalt.err (!%p470_p12)
}
  0x2f   : > { %386 = dma.hbm_to_vmem [thread:$0]  (!%p692_p0), %s684_s30, 32, %s688_s4, %s136_s6  }
  0x30   : > { %p840_p1 = scmp.lt.s32.totalorder %s590_s14, 3  ;;  %p841_p2 = scmp.ge.s32.totalorder %s590_s14, 1 }
  0x31   : > { %s737_s16 = scalar_lea.hbm %s831_s1, %s374_s27  ;;  %s160_s18 = scalar_lea.vmem [#allocation5], %s359_s26 }
  0x32   : > { %p728_p7 = pnand %p841_p2, %p840_p1  ;;  %s170_s19 = sshll.u32 %s160_s18, 4  ;;  %s171_s19 = int_to_ptr.vmem [resolvable:$true] %s170_s19 }
  0x33   : > { %s157_s30 = scalar_lea.sflag [#allocation6], %s675_s25  ;;  %s474_s4 = scalar_lea.hbm %s737_s16, 32 }
  0x34   : > { %s842_s7 = scalar_select %p728_p7, 1, 0 }
  0x35   : > { %p475_p9 = scmp.ne.s32.totalorder %s737_s16, %s474_s4  ;;  %s479_s27 = scalar_lea.hbm %s831_s1, 64 }
  0x36   : > { %p480_p3 = scmp.lt.u32.totalorder %s737_s16, %s831_s1  ;;  %p481_p6 = scmp.lt.u32.totalorder %s479_s27, %s474_s4 }
  0x37   : > { %p477_p11 = pnand %p475_p9, %p446_p5  ;;  %p483_p10 = scmp.lt.u32.totalorder %s474_s4, %s737_s16 }
  0x38   : > { %p482_p4 = por %p481_p6, %p480_p3 }
  0x39   : > { %p478_p13 = pneg %p477_p11 }
  0x3a   : > { %p484_p12 = por %p483_p10, %p482_p4 }
  0x3c   : > { %p485_p1 = pnand %p484_p12, %p478_p13 }
  0x3e   : > { %488 = shalt.err (!%p485_p1)
}
  0x3f   : > { %s489_s25 = scalar_lea.vmem %s171_s19, 32  ;;  %s593_s26 = smov [#allocation5]  }
  0x40   : > { %p490_p2 = scmp.ne.s32.totalorder %s171_s19, %s489_s25  ;;  %s494_s3 = sshll.u32 %s593_s26, 4  ;;  %s495_s3 = int_to_ptr.vmem [resolvable:$false] %s494_s3 }
  0x41   : > { %s496_s8 = scalar_lea.vmem %s495_s3, 64  ;;  %p497_p8 = scmp.lt.s32.totalorder %s171_s19, %s495_s3 }
  0x42   : > { %p492_p9 = pnand %p490_p2, %p446_p5  ;;  %p498_p7 = scmp.lt.s32.totalorder %s496_s8, %s489_s25 }
  0x44   : > { %p493_p11 = pneg %p492_p9  ;;  %p499_p3 = por %p498_p7, %p497_p8 }
  0x46   : > { %p500_p6 = pnand %p499_p3, %p493_p11 }
  0x48   : > { %503 = shalt.err (!%p500_p6)
}
  0x49   : > { %389 = dma.hbm_to_vmem [thread:$0]  (!%p692_p0), %s737_s16, 32, %s171_s19, %s157_s30  }
  0x4a   : > { %p843_p13 = scmp.ne.s32.totalorder %s842_s7, 0 }
  0x4b   : > { %s764_s15 = sand.u32 (!%p843_p13), 1, %s574_s10   ;;  %p844_p5 = scmp.ne.s32.totalorder (!%p843_p13), %s836_s21, 0 }
  0x4c   : > { %179 = sbr.rel (%p843_p13) target bundleno = 112 (0x70), region = 28  ;;  %s366_s18 = sshll.u32 (!%p843_p13), %s764_s15, 1 }
  0x4d   : > { %s182_s4 = scalar_lea.sflag (!%p843_p13), [#allocation3], %s764_s15  ;;  %s185_s6 = scalar_lea.vmem (!%p843_p13), [#allocation2], %s366_s18 }
  0x53   : > { %557 = dma.done.wait (%p844_p5), %s182_s4, 32  }
  0x54   : > { %559 = vsyncadd (%p844_p5), %s182_s4, 4294967264  ;;  %s191_s5 = scalar_lea.sflag [#allocation6], %s764_s15  ;;  %s194_s16 = scalar_lea.vmem [#allocation5], %s366_s18 }
  0x55   : > { %561 = dma.done.wait (%p844_p5), %s191_s5, 32  }
  0x56   : > { %563 = vsyncadd (%p844_p5), %s191_s5, 4294967264  ;;  %v223_v0 = vlaneseq  ;;  %s219_s7 = scalar_lea.vmem [#allocation7], %s366_s18  ;;  %s376_s30 = sshll.u32 %s582_s12, 5  ;;  %v220_v1 = vld [vmem:[%s185_s6] sm:$0x3] }
  0x57   : > { %s245_s19 = sshll.u32 %s219_s7, 4  ;;  %v221_v2 = vld [vmem:[%s194_s16] sm:$0x3]  ;;  %s783_s21 = scalar_lea.hbm %s832_s2, %s376_s30  ;;  %s778_s19 = int_to_ptr.vmem [resolvable:$true] %s245_s19 }
  0x58   : > { %vm225_vm0 = vcmp.lt.s32.totalorder %v223_v0, 256  ;;  %v222_v3 = vadd.f32 %v221_v2, %v220_v1  ;;  %s229_s28 = scalar_lea.sflag [#allocation4], %s764_s15  ;;  %s504_s29 = scalar_lea.vmem %s778_s19, 32 }
  0x59   : > { %p505_p8 = scmp.ne.s32.totalorder %s778_s19, %s504_s29  ;;  %p845_p0 = scmp.ne.s32.totalorder %s837_s22, 0 }
  0x5a   : > { %227 = vst.msk [vmem:[%s219_s7] sm:$0x3] %vm225_vm0, %v222_v3  ;;  %s594_s12 = smov [#allocation7]  }
  0x5b   : > { %p506_p7 = pnand %p505_p8, %p845_p0  ;;  %s508_s25 = sshll.u32 %s594_s12, 4  ;;  %s509_s25 = int_to_ptr.vmem [resolvable:$false] %s508_s25 }
  0x5c   : > { %s510_s26 = scalar_lea.vmem %s509_s25, 64  ;;  %p511_p10 = scmp.lt.s32.totalorder %s778_s19, %s509_s25 }
  0x5d   : > { %p507_p4 = pneg %p506_p7  ;;  %p512_p12 = scmp.lt.s32.totalorder %s510_s26, %s504_s29 }
  0x5f   : > { %p513_p1 = por %p512_p12, %p511_p10 }
  0x61   : > { %p514_p2 = pnand %p513_p1, %p507_p4 }
  0x63   : > { %517 = shalt.err (!%p514_p2)
}
  0x64   : > { %s518_s3 = scalar_lea.hbm %s783_s21, 32  ;;  %s522_s18 = scalar_lea.hbm %s832_s2, 64 }
  0x65   : > { %p519_p9 = scmp.ne.s32.totalorder %s783_s21, %s518_s3  ;;  %p523_p6 = scmp.lt.u32.totalorder %s783_s21, %s832_s2 }
  0x66   : > { %p524_p13 = scmp.lt.u32.totalorder %s522_s18, %s518_s3  ;;  %p526_p8 = scmp.lt.u32.totalorder %s518_s3, %s783_s21 }
  0x67   : > { %p520_p11 = pnand %p519_p9, %p845_p0 }
  0x68   : > { %p525_p5 = por %p524_p13, %p523_p6 }
  0x69   : > { %p521_p3 = pneg %p520_p11 }
  0x6a   : > { %p527_p7 = por %p526_p8, %p525_p5 }
  0x6c   : > { %p528_p4 = pnand %p527_p7, %p521_p3 }
  0x6e   : > { %531 = shalt.err (!%p528_p4)
}
  0x6f   : > { %381 = dma.vmem_to_hbm [thread:$0]  (%p845_p0), %s778_s19, 32, %s783_s21, %s229_s28  }
  0x70 PF: > { %s257_s5 = sand.u32 1, %s570_s9   ;;  %p846_p10 = scmp.ne.s32.totalorder %s838_s24, 0 }
  0x71   : > { %p847_p12 = scmp.ge.s32.totalorder %s590_s14, 2  ;;  %s258_s16 = scalar_lea.sflag [#allocation4], %s257_s5 }
  0x73   : > { %p391_p1 = pnand %p847_p12, %p846_p10 }
  0x75   : > { %565 = dma.done.wait (!%p391_p1), %s258_s16, 32  }
  0x76   : > { %567 = vsyncadd (!%p391_p1), %s258_s16, 4294967264  ;;  %s21_s14 = sadd.s32 1, %s590_s14   ;;  %s848_s9 = smov %s574_s10 }
  0x77   : > { %p18_p2 = scmp.ge.s32.totalorder %s21_s14, 4   ;;  %s849_s10 = smov %s578_s11 }
  0x78   : > { %s850_s11 = smov %s666_s23  ;;  %s851_s12 = smov %s586_s13 }
  0x79   : > { %s852_s13 = smov %s854_s17  ;;  %20 = sbr.rel (!%p18_p2) target bundleno = 8 (0x8), region = 86 }
  0x80   :  { %263 = vsyncpa [#allocation3], 1 }
  0x81   :  { %265 = vsyncpa [#allocation3 + $0x1], 1 }
  0x82   :  { %266 = vsyncpa [#allocation6], 1 }
  0x83   :  { %268 = vsyncpa [#allocation6 + $0x1], 1 }
  0x84   :  { %269 = vsyncpa [#allocation4], 1 }
  0x85   :  { %271 = vsyncpa [#allocation4 + $0x1], 1 }

</bundles_post_ra>
